<compile_context>
chip_gen: v5e
topology: v5e:2x2
jax: 0.10.0
libtpu: 0.0.40
codegen_flags: <defaults>
</compile_context>

<pallas_src>
import functools

import jax
import jax.numpy as jnp
from jax.experimental import pallas as pl
from jax.experimental.pallas import tpu as pltpu


LANES = 128     # lane width (last dim of every tile)
MAX_TM = 1024   # max rows per tile: (1024, 128) f32 = 512 KiB per input block
NCORES = 2      # leading "parallel" axis for megacore (v7x); 1 on small inputs


def _dice_kernel(p_ref, t_ref, oi_ref, ou_ref, *,
                 rows, tm, tiles_per_core, need_mask):
    """Accumulate sum(p*t) and sum(p+t) over row tiles for one core.

    p_ref/t_ref: (tm, LANES) input tiles.
    oi_ref/ou_ref: (1, 8, LANES) per-core partial sums (resident accumulators).
    """
    c = pl.program_id(0)          # core slot
    j = pl.program_id(1)          # tile index within this core's range

    @pl.when(j == 0)
    def _():
        oi_ref[...] = jnp.zeros_like(oi_ref)
        ou_ref[...] = jnp.zeros_like(ou_ref)

    p = p_ref[...].astype(jnp.float32)
    t = t_ref[...].astype(jnp.float32)

    def accumulate(pv, tv):
        # Fold (tm, 128) -> (8, 128) with lane-parallel VPU adds; no per-step
        # cross-lane reduction and no scalar SMEM round trips.
        oi_ref[0] += jnp.sum((pv * tv).reshape(tm // 8, 8, LANES), axis=0)
        ou_ref[0] += jnp.sum((pv + tv).reshape(tm // 8, 8, LANES), axis=0)

    if need_mask:
        # Global (unclamped) tile index -> first global row of this tile.
        row0 = (c * tiles_per_core + j) * tm
        is_full = row0 + tm <= rows

        @pl.when(is_full)
        def _():
            # Interior tile: no masking work at all.
            accumulate(p, t)

        @pl.when(jnp.logical_not(is_full))
        def _():
            # Boundary (or fully out-of-range, clamped-reread) tile.
            ridx = jax.lax.broadcasted_iota(jnp.int32, (tm, LANES), 0)
            valid = ridx < (rows - row0)
            zero = jnp.float32(0.0)
            accumulate(jnp.where(valid, p, zero), jnp.where(valid, t, zero))
    else:
        accumulate(p, t)


def dice_loss(predicted, target, smooth=1e-05):
    assert predicted.shape == target.shape
    p = predicted.reshape(-1)
    t = target.reshape(-1)
    n = p.shape[0]

    # Only pad the tail fragment (< 128 elements) so the flat vector reshapes
    # to a lane-dense (rows, 128) slab.  Zero padding is sum-neutral here;
    # when n % 128 == 0 (the common case) this is a pure bitcast, no copy.
    rem = n % LANES
    if rem:
        pad = LANES - rem
        p = jnp.pad(p, (0, pad))
        t = jnp.pad(t, (0, pad))
    rows = p.shape[0] // LANES
    p2 = p.reshape(rows, LANES)
    t2 = t.reshape(rows, LANES)

    # Row-tile height: multiple of 8, large to amortize per-step overhead,
    # small enough that 2 inputs x 2 pipeline buffers stay ~2 MiB of VMEM
    # (safe under every chip's scoped-VMEM default).
    tm = min(MAX_TM, ((rows + 7) // 8) * 8)
    num_tiles = pl.cdiv(rows, tm)

    ncores = NCORES if num_tiles >= NCORES else 1
    tiles_per_core = pl.cdiv(num_tiles, ncores)
    # Mask is needed whenever the covered row range overshoots the real rows.
    need_mask = (ncores * tiles_per_core * tm) != rows

    kernel = functools.partial(
        _dice_kernel,
        rows=rows, tm=tm, tiles_per_core=tiles_per_core, need_mask=need_mask)

    def in_map(c, j):
        # Clamp so a fully-out-of-range tile (possible for the last core when
        # num_tiles is odd) re-reads the last valid block; the in-kernel mask
        # (driven by the *unclamped* index) zeroes its contribution.
        return (jnp.minimum(c * tiles_per_core + j, num_tiles - 1), 0)

    parts_i, parts_u = pl.pallas_call(
        kernel,
        out_shape=(
            jax.ShapeDtypeStruct((ncores, 8, LANES), jnp.float32),
            jax.ShapeDtypeStruct((ncores, 8, LANES), jnp.float32),
        ),
        grid=(ncores, tiles_per_core),
        in_specs=[
            pl.BlockSpec((tm, LANES), in_map),
            pl.BlockSpec((tm, LANES), in_map),
        ],
        out_specs=(
            pl.BlockSpec((1, 8, LANES), lambda c, j: (c, 0, 0)),
            pl.BlockSpec((1, 8, LANES), lambda c, j: (c, 0, 0)),
        ),
        compiler_params=pltpu.CompilerParams(
            dimension_semantics=("parallel", "arbitrary"),
        ),
    )(p2, t2)

    # Tiny final combine (ncores x 8 x 128 per accumulator) + dice epilogue.
    intersection = jnp.sum(parts_i)
    union = jnp.sum(parts_u)
    smooth = jnp.float32(smooth)
    dice = (2.0 * intersection + smooth) / (union + smooth)
    return 1.0 - dice


def dice_loss_ref(predicted, target, smooth=1e-05):
    predicted = predicted.astype(jnp.float32)
    target = target.astype(jnp.float32)
    intersection = jnp.sum(predicted * target)
    union = jnp.sum(predicted) + jnp.sum(target)
    dice = (2.0 * intersection + smooth) / (union + smooth)
    return 1.0 - dice


if __name__ == "__main__":
    key = jax.random.PRNGKey(0)
    k1, k2 = jax.random.split(key)

    # NCHW-like shape, consistent with a segmentation-style dice loss.
    x_shape = (2, 4, 16, 16)
    predicted = jax.nn.sigmoid(jax.random.normal(k1, x_shape, dtype=jnp.float32))
    target = (jax.random.uniform(k2, x_shape) > 0.5).astype(jnp.float32)

    loss_fn = jax.jit(dice_loss)
    loss = jax.block_until_ready(loss_fn(predicted, target))
    ref = dice_loss_ref(predicted, target)
    assert jnp.allclose(loss, ref, rtol=1e-5, atol=1e-6), (loss, ref)

    # Also exercise a ragged, multi-tile, bf16 case (masking + dual-core path).
    k3, k4 = jax.random.split(k2)
    big_shape = (3, 5, 77, 131)  # n not a multiple of 128 or TM*128
    pb = jax.nn.sigmoid(jax.random.normal(k3, big_shape)).astype(jnp.bfloat16)
    tb = (jax.random.uniform(k4, big_shape) > 0.5).astype(jnp.bfloat16)
    loss_b = jax.block_until_ready(jax.jit(dice_loss)(pb, tb))
    ref_b = dice_loss_ref(pb, tb)
    assert jnp.allclose(loss_b, ref_b, rtol=1e-3, atol=1e-4), (loss_b, ref_b)

    print("KERNEL_OK")
</pallas_src>

<mosaic_0001>
module attributes {stable_mosaic.version = 11 : i64} {
  func.func @_dice_kernel(%arg0: i32, %arg1: i32, %arg2: memref<16x128xf32, #tpu.memory_space<vmem>>, %arg3: memref<16x128xf32, #tpu.memory_space<vmem>>, %arg4: memref<1x8x128xf32, #tpu.memory_space<vmem>>, %arg5: memref<1x8x128xf32, #tpu.memory_space<vmem>>) attributes {dimension_semantics = [#tpu.dimension_semantics<parallel>, #tpu.dimension_semantics<arbitrary>], iteration_bounds = array<i64: 1, 1>, scalar_prefetch = 0 : i64, scratch_operands = 0 : i64, tpu.core_type = #tpu.core_type<tc>, window_params = [{transform_indices = @transform_0, window_bounds = array<i64: 16, 128>}, {transform_indices = @transform_1, window_bounds = array<i64: 16, 128>}, {transform_indices = @transform_2, window_bounds = array<i64: 1, 8, 128>}, {transform_indices = @transform_3, window_bounds = array<i64: 1, 8, 128>}]} {
    %c0_i32 = arith.constant 0 : i32
    %0 = arith.cmpi eq, %arg1, %c0_i32 : i32
    %1 = arith.extui %0 : i1 to i32
    %c0_i32_0 = arith.constant 0 : i32
    %2 = arith.cmpi ne, %1, %c0_i32_0 : i32
    scf.if %2 {
      %cst_17 = arith.constant 0.000000e+00 : f32
      %23 = vector.broadcast %cst_17 : f32 to vector<1x8x128xf32>
      %c0_18 = arith.constant 0 : index
      %c0_19 = arith.constant 0 : index
      %c0_20 = arith.constant 0 : index
      %24 = vector.load %arg4[%c0_18, %c0_19, %c0_20] : memref<1x8x128xf32, #tpu.memory_space<vmem>>, vector<1x8x128xf32>
      tpu.vector_store %arg4[%c0_18, %c0_19, %c0_20], %23 {strides = array<i32>} : memref<1x8x128xf32, #tpu.memory_space<vmem>>, vector<1x8x128xf32>,
      %cst_21 = arith.constant 0.000000e+00 : f32
      %25 = vector.broadcast %cst_21 : f32 to vector<1x8x128xf32>
      %c0_22 = arith.constant 0 : index
      %c0_23 = arith.constant 0 : index
      %c0_24 = arith.constant 0 : index
      %26 = vector.load %arg5[%c0_22, %c0_23, %c0_24] : memref<1x8x128xf32, #tpu.memory_space<vmem>>, vector<1x8x128xf32>
      tpu.vector_store %arg5[%c0_22, %c0_23, %c0_24], %25 {strides = array<i32>} : memref<1x8x128xf32, #tpu.memory_space<vmem>>, vector<1x8x128xf32>,
    } else {
    }
    %c0 = arith.constant 0 : index
    %c0_1 = arith.constant 0 : index
    %3 = vector.load %arg2[%c0, %c0_1] : memref<16x128xf32, #tpu.memory_space<vmem>>, vector<16x128xf32>
    %c0_2 = arith.constant 0 : index
    %c0_3 = arith.constant 0 : index
    %4 = vector.load %arg3[%c0_2, %c0_3] : memref<16x128xf32, #tpu.memory_space<vmem>>, vector<16x128xf32>
    %c0_4 = arith.constant 0 : index
    %c0_5 = arith.constant 0 : index
    %c0_6 = arith.constant 0 : index
    %5 = vector.load %arg4[%c0_4, %c0_5, %c0_6] : memref<1x8x128xf32, #tpu.memory_space<vmem>>, vector<1x8x128xf32>
    %6 = vector.shape_cast %5 : vector<1x8x128xf32> to vector<8x128xf32>
    %7 = arith.mulf %3, %4 : vector<16x128xf32>
    %8 = vector.shape_cast %7 : vector<16x128xf32> to vector<2x8x128xf32>
    %cst = arith.constant dense<0.000000e+00> : vector<8x128xf32>
    %9 = vector.multi_reduction <add>, %8, %cst [0] : vector<2x8x128xf32> to vector<8x128xf32>
    %10 = arith.addf %6, %9 : vector<8x128xf32>
    %c0_7 = arith.constant 0 : index
    %c0_8 = arith.constant 0 : index
    %c0_9 = arith.constant 0 : index
    %11 = vector.load %arg4[%c0_7, %c0_8, %c0_9] : memref<1x8x128xf32, #tpu.memory_space<vmem>>, vector<1x8x128xf32>
    %12 = vector.shape_cast %11 : vector<1x8x128xf32> to vector<8x128xf32>
    %13 = vector.shape_cast %10 : vector<8x128xf32> to vector<1x8x128xf32>
    tpu.vector_store %arg4[%c0_7, %c0_8, %c0_9], %13 {strides = array<i32>} : memref<1x8x128xf32, #tpu.memory_space<vmem>>, vector<1x8x128xf32>,
    %c0_10 = arith.constant 0 : index
    %c0_11 = arith.constant 0 : index
    %c0_12 = arith.constant 0 : index
    %14 = vector.load %arg5[%c0_10, %c0_11, %c0_12] : memref<1x8x128xf32, #tpu.memory_space<vmem>>, vector<1x8x128xf32>
    %15 = vector.shape_cast %14 : vector<1x8x128xf32> to vector<8x128xf32>
    %16 = arith.addf %3, %4 : vector<16x128xf32>
    %17 = vector.shape_cast %16 : vector<16x128xf32> to vector<2x8x128xf32>
    %cst_13 = arith.constant dense<0.000000e+00> : vector<8x128xf32>
    %18 = vector.multi_reduction <add>, %17, %cst_13 [0] : vector<2x8x128xf32> to vector<8x128xf32>
    %19 = arith.addf %15, %18 : vector<8x128xf32>
    %c0_14 = arith.constant 0 : index
    %c0_15 = arith.constant 0 : index
    %c0_16 = arith.constant 0 : index
    %20 = vector.load %arg5[%c0_14, %c0_15, %c0_16] : memref<1x8x128xf32, #tpu.memory_space<vmem>>, vector<1x8x128xf32>
    %21 = vector.shape_cast %20 : vector<1x8x128xf32> to vector<8x128xf32>
    %22 = vector.shape_cast %19 : vector<8x128xf32> to vector<1x8x128xf32>
    tpu.vector_store %arg5[%c0_14, %c0_15, %c0_16], %22 {strides = array<i32>} : memref<1x8x128xf32, #tpu.memory_space<vmem>>, vector<1x8x128xf32>,
    return
  }
  func.func @transform_0(%arg0: i32, %arg1: i32) -> (i32, i32) {
    %c1_i32 = arith.constant 1 : i32
    %0 = arith.muli %arg0, %c1_i32 : i32
    %1 = arith.addi %0, %arg1 : i32
    %c0_i32 = arith.constant 0 : i32
    %2 = arith.minsi %1, %c0_i32 : i32
    %c0_i32_0 = arith.constant 0 : i32
    %c0_i32_1 = arith.constant 0 : i32
    return %2, %c0_i32_0 : i32, i32
  }
  func.func @transform_1(%arg0: i32, %arg1: i32) -> (i32, i32) {
    %c1_i32 = arith.constant 1 : i32
    %0 = arith.muli %arg0, %c1_i32 : i32
    %1 = arith.addi %0, %arg1 : i32
    %c0_i32 = arith.constant 0 : i32
    %2 = arith.minsi %1, %c0_i32 : i32
    %c0_i32_0 = arith.constant 0 : i32
    %c0_i32_1 = arith.constant 0 : i32
    return %2, %c0_i32_0 : i32, i32
  }
  func.func @transform_2(%arg0: i32, %arg1: i32) -> (i32, i32, i32) {
    %c0_i32 = arith.constant 0 : i32
    %c0_i32_0 = arith.constant 0 : i32
    %c0_i32_1 = arith.constant 0 : i32
    return %arg0, %c0_i32, %c0_i32_0 : i32, i32, i32
  }
  func.func @transform_3(%arg0: i32, %arg1: i32) -> (i32, i32, i32) {
    %c0_i32 = arith.constant 0 : i32
    %c0_i32_0 = arith.constant 0 : i32
    %c0_i32_1 = arith.constant 0 : i32
    return %arg0, %c0_i32, %c0_i32_0 : i32, i32, i32
  }
}

</mosaic_0001>

<bundles_post_ra>
// kernel: dice_loss.1
= control target key start
LH: loop header
LB: loop body
LE: loop exit
PB: predicated region body
PF: predicated region fallthrough
CT: control target
= control target key end

     0   :  { %s158_s0 = inlined_call_operand.vmem [shape: f32[16,128], index: 0, kind: input, shape index: {}]   ;;  %s159_s1 = inlined_call_operand.vmem [shape: f32[16,128], index: 1, kind: input, shape index: {}]   ;;  %s160_s2 = inlined_call_operand.vmem [shape: f32[1,8,128], index: 2, kind: output, shape index: {0}]   ;;  %s161_s3 = inlined_call_operand.vmem [shape: f32[1,8,128], index: 3, kind: output, shape index: {1}]  }
   0x1   :  { %v83_v0 = vld [vmem:[%s158_s0] sm:$0xff]  ;;  %v84_v1 = vld [vmem:[%s158_s0 + $0x8] sm:$0xff] }
   0x2   :  { %v85_v2 = vld [vmem:[%s159_s1] sm:$0xff]  ;;  %v86_v3 = vld [vmem:[%s159_s1 + $0x8] sm:$0xff] }
   0x3   :  { %v88_v4 = vmul.f32 %v85_v2, %v83_v0  ;;  %v94_v5 = vadd.f32 %v85_v2, %v83_v0  ;;  %v89_v6 = vmul.f32 %v86_v3, %v84_v1  ;;  %v95_v7 = vadd.f32 %v86_v3, %v84_v1 }
   0x5   :  { %v90_v8 = vadd.f32 %v89_v6, %v88_v4  ;;  %v96_v9 = vadd.f32 %v95_v7, %v94_v5 }
   0x7   :  { %92 = vst [vmem:[%s160_s2] sm:$0xff] %v90_v8 }
   0x8   :  { %98 = vst [vmem:[%s161_s3] sm:$0xff] %v96_v9 }

</bundles_post_ra>
